<compile_context>
chip_gen: v7x
topology: tpu7x:2x2x1
jax: 0.10.0
libtpu: 0.0.40
codegen_flags: <defaults>
</compile_context>

<pallas_src>
import functools
import hashlib
import json

import jax
import jax.numpy as jnp
from jax import lax
from jax.experimental import pallas as pl
from jax.experimental.pallas import tpu as pltpu


# ----------------------------------------------------------------------------
# Chip / VMEM discovery
# ----------------------------------------------------------------------------
def _cdiv(a, b):
    return (a + b - 1) // b


def _round_up(x, m):
    return _cdiv(x, m) * m


def _chip_info():
    """Return (per-core VMEM bytes, is_v7x, multi_tensorcore) with safe fallbacks."""
    kind = ""
    try:
        kind = jax.devices()[0].device_kind.lower()
    except Exception:
        pass
    is_v7 = "v7" in kind

    vmem_cap = None
    try:
        info = pltpu.get_tpu_info()
        cap = int(getattr(info, "vmem_capacity_bytes", 0) or 0)
        if cap:
            vmem_cap = cap
    except Exception:
        pass
    if vmem_cap is None:
        vmem_cap = (64 if is_v7 else 128) * 1024 * 1024
    if is_v7:
        # v7x has 64 MiB per TensorCore; the query may report per-chip capacity,
        # so hard-clamp regardless of what it returns.
        vmem_cap = min(vmem_cap, 64 * 1024 * 1024)

    multi_tc = is_v7  # v7x: 2 TensorCores per chip share the grid's parallel axes
    return vmem_cap, is_v7, multi_tc


# ----------------------------------------------------------------------------
# Tile planning: big output tiles, minimal padding, VMEM-budget aware
# ----------------------------------------------------------------------------
_TM_TARGET = 1024
_TN_TARGET = 1024
_TK_TARGET = 1024
_ALIGN_M = 128
_ALIGN_N = 128
_ALIGN_K = 128


def _fit_dim(dim, target, align):
    """Full-dim block if it fits in one target tile (zero padding); otherwise
    a balanced tile size (same tile count as `target`, rounded to `align`,
    minimizing padding)."""
    if dim <= target:
        return dim
    n_tiles = _cdiv(dim, target)
    return _round_up(_cdiv(dim, n_tiles), align)


def _pick_tiles(M, N, K, in_bytes, out_bytes, tile_budget, multi_tc, needs_acc):
    tm = _fit_dim(M, _TM_TARGET, _ALIGN_M)
    tn = _fit_dim(N, _TN_TARGET, _ALIGN_N)
    tk = _fit_dim(K, _TK_TARGET, _ALIGN_K)

    def working_set(tm_, tn_, tk_):
        ws = (2 * tm_ * tk_ * in_bytes      # A tile, double-buffered
              + 2 * tk_ * tn_ * in_bytes    # B tile, double-buffered
              + 2 * tm_ * tn_ * out_bytes)  # output tile, double-buffered
        if needs_acc:
            ws += tm_ * tn_ * 4             # f32 accumulator scratch
        return ws

    # Shrink tk first (it contributes no HBM reuse), then tn, then tm.
    while working_set(tm, tn, tk) > tile_budget:
        if tk > 512:
            tk = max(512, _round_up(tk // 2, _ALIGN_K))
        elif tn > 256:
            tn = max(256, _round_up(tn // 2, _ALIGN_N))
        elif tm > 256:
            tm = max(256, _round_up(tm // 2, _ALIGN_M))
        elif tk > 128:
            tk = max(128, _round_up(tk // 2, _ALIGN_K))
        elif tn > 128:
            tn = 128
        elif tm > 8:
            tm = max(8, _round_up(tm // 2, 8))
        else:
            break

    # On 2-TensorCore chips (v7x) keep >= 4 output tiles on large problems so
    # both cores get work with some load-balance slack; 1-TC chips skip this
    # (splitting there only adds grid-step overhead).
    if multi_tc and M * N >= 1024 * 1024:
        while _cdiv(M, tm) * _cdiv(N, tn) < 4:
            if tn >= tm and tn > 256:
                tn = _round_up(_cdiv(tn, 2), _ALIGN_N)
            elif tm > 256:
                tm = _round_up(_cdiv(tm, 2), _ALIGN_M)
            else:
                break

    return tm, tn, tk


# ----------------------------------------------------------------------------
# Pallas kernels: tiled matmul, reduction axis last (P1 + P3 + P9)
# ----------------------------------------------------------------------------
def _matmul_kernel_inplace(a_ref, b_ref, o_ref, *, dot_precision):
    """f32 output: accumulate directly into the resident output tile
    (no acc scratch, no final copy/cast)."""
    prod = jnp.dot(a_ref[...], b_ref[...],
                   preferred_element_type=jnp.float32,
                   precision=dot_precision)

    @pl.when(pl.program_id(2) == 0)
    def _():
        o_ref[...] = prod

    @pl.when(pl.program_id(2) > 0)
    def _():
        o_ref[...] += prod


def _matmul_kernel_acc(a_ref, b_ref, o_ref, acc_ref, *, dot_precision):
    """Non-f32 output: f32 scratch accumulator, cast on the last K step."""
    prod = jnp.dot(a_ref[...], b_ref[...],
                   preferred_element_type=jnp.float32,
                   precision=dot_precision)

    @pl.when(pl.program_id(2) == 0)
    def _():
        acc_ref[...] = prod

    @pl.when(pl.program_id(2) > 0)
    def _():
        acc_ref[...] += prod

    @pl.when(pl.program_id(2) == pl.num_programs(2) - 1)
    def _():
        o_ref[...] = acc_ref[...].astype(o_ref.dtype)


def pallas_matmul(a, b, *, precision="default"):
    """output0[N, M] = sum_K input0[N, K] * input1[K, M]   (Pallas TPU).

    precision:
      "default" : native single-pass MXU matmul (f32 accumulator).  Default.
      "highest" : explicit high-accuracy matmul (multi-pass on the MXU).
      "bf16"    : cast floating inputs to bf16 (keeps the f32 accumulator).
    """
    M, K = a.shape
    K2, N = b.shape
    assert K == K2, (a.shape, b.shape)

    out_dtype = jnp.result_type(a.dtype, b.dtype)

    if (precision == "bf16"
            and jnp.issubdtype(a.dtype, jnp.floating)
            and jnp.issubdtype(b.dtype, jnp.floating)):
        a = a.astype(jnp.bfloat16)
        b = b.astype(jnp.bfloat16)
        dot_precision = None
    elif precision == "highest":
        dot_precision = lax.Precision.HIGHEST
    else:
        dot_precision = None

    in_bytes = max(a.dtype.itemsize, b.dtype.itemsize)
    out_bytes = jnp.dtype(out_dtype).itemsize

    vmem_cap, is_v7, multi_tc = _chip_info()
    if is_v7:
        vmem_limit = min(int(0.85 * vmem_cap), 56 * 1024 * 1024)
    else:
        vmem_limit = min(int(0.85 * vmem_cap), 108 * 1024 * 1024)
    tile_budget = int(0.85 * vmem_limit)

    needs_acc = out_dtype != jnp.float32
    tm, tn, tk = _pick_tiles(M, N, K, in_bytes, out_bytes, tile_budget,
                             multi_tc, needs_acc)

    M_pad, N_pad, K_pad = _round_up(M, tm), _round_up(N, tn), _round_up(K, tk)

    # Pad only dims that genuinely need it (full-dim tiles need no pad at all;
    # zero padding along K is accumulation-neutral).
    # TODO(synk): replace the ragged-K pad with in-kernel masking to avoid the
    #             padded-copy HBM round trip on very skinny problems.
    if (M_pad, K_pad) != (M, K):
        a = jnp.pad(a, ((0, M_pad - M), (0, K_pad - K)))
    if (K_pad, N_pad) != (K, N):
        b = jnp.pad(b, ((0, K_pad - K), (0, N_pad - N)))

    grid = (M_pad // tm, N_pad // tn, K_pad // tk)

    # Realistic streamed traffic after tiling: A is re-read once per N tile,
    # B once per M tile, output written once.
    cost = pl.CostEstimate(
        flops=2 * M_pad * N_pad * K_pad,
        transcendentals=0,
        bytes_accessed=int(grid[1] * M_pad * K_pad * in_bytes
                           + grid[0] * K_pad * N_pad * in_bytes
                           + M_pad * N_pad * out_bytes),
    )

    if needs_acc:
        kernel = functools.partial(_matmul_kernel_acc, dot_precision=dot_precision)
        scratch_shapes = [pltpu.VMEM((tm, tn), jnp.float32)]
    else:
        kernel = functools.partial(_matmul_kernel_inplace, dot_precision=dot_precision)
        scratch_shapes = []

    out = pl.pallas_call(
        kernel,
        out_shape=jax.ShapeDtypeStruct((M_pad, N_pad), out_dtype),
        grid_spec=pltpu.PrefetchScalarGridSpec(
            num_scalar_prefetch=0,
            grid=grid,
            in_specs=[
                pl.BlockSpec((tm, tk), lambda i, j, k: (i, k)),
                pl.BlockSpec((tk, tn), lambda i, j, k: (k, j)),
            ],
            out_specs=pl.BlockSpec((tm, tn), lambda i, j, k: (i, j)),
            scratch_shapes=scratch_shapes,
        ),
        compiler_params=pltpu.CompilerParams(
            dimension_semantics=("parallel", "parallel", "arbitrary"),
            vmem_limit_bytes=vmem_limit,
        ),
        cost_estimate=cost,
    )(a, b)

    if (M_pad, N_pad) != (M, N):
        out = out[:M, :N]
    return out


# ----------------------------------------------------------------------------
# CustomOp: same interface as the PyTorch module, Pallas backend.
# ----------------------------------------------------------------------------
MATMUL_IR = "output0[N, M] +=! input0[N, K] * input1[K, M]"


def generate_antares_expression(antares_ir, inputs):
    # Mirrors the PyTorch helper, for hashing/caching parity (no server call).
    input_dict = {}
    for k, v in inputs:
        input_dict[k] = {"dtype": str(v.dtype), "shape": list(v.shape)}
    return '- einstein_v2("%s", input_dict=%s)' % (
        antares_ir.replace('"', "`"),
        json.dumps(input_dict),
    )


class CustomOp:
    """Pallas-backed stand-in for frameworks/antares/pytorch/custom_op.CustomOp.

    Instead of POSTing the einstein_v2 IR to an Antares compile server, we map
    recognized IR expressions to locally-compiled Pallas TPU kernels and cache
    them by the same sha256 expression hash the original module uses.
    """

    def __init__(self, server_addr="localhost:8880", precision="default"):
        self.server_addr = server_addr  # unused: no network in this backend
        self.precision = precision
        self.ops = dict()

    def _compile(self, antares_ir):
        ir = " ".join(antares_ir.split())
        if ir == MATMUL_IR:
            fn = jax.jit(functools.partial(pallas_matmul, precision=self.precision))
            return ["output0"], fn
        # TODO(synk): general einstein_v2 DSL -> Pallas lowering not implemented;
        # only the canonical matmul expression is supported.
        raise NotImplementedError(f"Unsupported Antares IR: {antares_ir}")

    def forward(self, antares_ir, values, keys=[]):
        if not keys:
            keys = [f"input{i}" for i in range(len(values))]
        antares_expr = generate_antares_expression(antares_ir, zip(keys, values))
        expr_hash = hashlib.sha256(antares_expr.encode()).hexdigest()
        if expr_hash in self.ops:
            output_names, fn = self.ops[expr_hash]
        else:
            output_names, fn = self._compile(antares_ir)
            self.ops[expr_hash] = (output_names, fn)
        self._output_names = output_names
        return fn(*values)

    __call__ = forward


# ----------------------------------------------------------------------------
# Demo / self-test
# ----------------------------------------------------------------------------
if __name__ == "__main__":
    key = jax.random.PRNGKey(0)
    k0, k1, k2, k3, k4, k5 = jax.random.split(key, 6)

    # 1) Canonical matmul via the CustomOp interface (default precision).
    N_, K_, M_ = 128, 256, 128
    x = jax.random.normal(k0, (N_, K_), dtype=jnp.float32)
    w = jax.random.normal(k1, (K_, M_), dtype=jnp.float32)
    ref_hi = jnp.dot(x, w, precision=lax.Precision.HIGHEST)

    op = CustomOp()
    out = jax.block_until_ready(op(MATMUL_IR, [x, w]))
    assert out.shape == (N_, M_), out.shape
    assert jnp.allclose(out, ref_hi, atol=5e-1, rtol=5e-2), "default path mismatch"

    # Second call hits the expression-hash cache, like the original module.
    out2 = jax.block_until_ready(op(MATMUL_IR, [x, w]))
    assert jnp.allclose(out2, out), "cache-hit mismatch"

    # 2) Explicit high-accuracy path, tight tolerance.
    out_hi = jax.block_until_ready(pallas_matmul(x, w, precision="highest"))
    assert jnp.allclose(out_hi, ref_hi, atol=1e-3, rtol=1e-3), "highest path mismatch"

    # 3) Odd shapes: full-dim blocks, no padding at all.
    a2 = jax.random.normal(k2, (200, 300), dtype=jnp.float32)
    b2 = jax.random.normal(k3, (300, 150), dtype=jnp.float32)
    out_odd = jax.block_until_ready(pallas_matmul(a2, b2, precision="highest"))
    ref_odd = jnp.dot(a2, b2, precision=lax.Precision.HIGHEST)
    assert out_odd.shape == (200, 150), out_odd.shape
    assert jnp.allclose(out_odd, ref_odd, atol=1e-3, rtol=1e-3), "full-dim mismatch"

    # 4) K larger than one tile: rebalanced tk, K-only padding, K accumulation.
    a3 = jax.random.normal(k4, (64, 2100), dtype=jnp.float32)
    b3 = jax.random.normal(k5, (2100, 256), dtype=jnp.float32)
    out_k = jax.block_until_ready(pallas_matmul(a3, b3, precision="highest"))
    ref_k = jnp.dot(a3, b3, precision=lax.Precision.HIGHEST)
    assert jnp.allclose(out_k, ref_k, atol=2e-2, rtol=2e-3), "K-tiled mismatch"

    # 5) bf16 fast path (f32 output, in-place accumulation) and native bf16
    #    inputs (bf16 output, f32 scratch-accumulator path).
    out_bf = jax.block_until_ready(pallas_matmul(x, w, precision="bf16"))
    assert jnp.allclose(out_bf, ref_hi, atol=5e-1, rtol=5e-2), "bf16 path mismatch"

    xb, wb = x.astype(jnp.bfloat16), w.astype(jnp.bfloat16)
    out_bb = jax.block_until_ready(pallas_matmul(xb, wb))
    assert out_bb.dtype == jnp.bfloat16, out_bb.dtype
    assert jnp.allclose(out_bb.astype(jnp.float32), ref_hi, atol=8e-1, rtol=8e-2), \
        "bf16-native path mismatch"

    print("KERNEL_OK")
</pallas_src>

<mosaic_0001>
module attributes {stable_mosaic.version = 11 : i64} {
  func.func @_matmul_kernel_inplace(%arg0: i32, %arg1: i32, %arg2: i32, %arg3: memref<128x256xf32, #tpu.memory_space<vmem>>, %arg4: memref<256x128xf32, #tpu.memory_space<vmem>>, %arg5: memref<128x128xf32, #tpu.memory_space<vmem>>) attributes {dimension_semantics = [#tpu.dimension_semantics<parallel>, #tpu.dimension_semantics<parallel>, #tpu.dimension_semantics<arbitrary>], iteration_bounds = array<i64: 1, 1, 1>, scalar_prefetch = 0 : i64, scratch_operands = 0 : i64, tpu.core_type = #tpu.core_type<tc>, window_params = [{transform_indices = @transform_0, window_bounds = array<i64: 128, 256>}, {transform_indices = @transform_1, window_bounds = array<i64: 256, 128>}, {transform_indices = @transform_2, window_bounds = array<i64: 128, 128>}]} {
    %c0 = arith.constant 0 : index
    %c0_0 = arith.constant 0 : index
    %0 = vector.load %arg3[%c0, %c0_0] : memref<128x256xf32, #tpu.memory_space<vmem>>, vector<128x256xf32>
    %c0_1 = arith.constant 0 : index
    %c0_2 = arith.constant 0 : index
    %1 = vector.load %arg4[%c0_1, %c0_2] : memref<256x128xf32, #tpu.memory_space<vmem>>, vector<256x128xf32>
    %cst = arith.constant dense<0.000000e+00> : vector<128x128xf32>
    %2 = tpu.matmul %0, %1, %cst {dimension_numbers = #tpu.dot_dimension_numbers<[1], [0], [0], [1], [0, 0, 1, 1], [], []>} : vector<128x256xf32>, vector<256x128xf32>, vector<128x128xf32> -> vector<128x128xf32>
    %c0_i32 = arith.constant 0 : i32
    %3 = arith.cmpi eq, %arg2, %c0_i32 : i32
    %4 = arith.extui %3 : i1 to i32
    %c0_i32_3 = arith.constant 0 : i32
    %5 = arith.cmpi ne, %4, %c0_i32_3 : i32
    scf.if %5 {
      %c0_6 = arith.constant 0 : index
      %c0_7 = arith.constant 0 : index
      %9 = vector.load %arg5[%c0_6, %c0_7] : memref<128x128xf32, #tpu.memory_space<vmem>>, vector<128x128xf32>
      tpu.vector_store %arg5[%c0_6, %c0_7], %2 {strides = array<i32>} : memref<128x128xf32, #tpu.memory_space<vmem>>, vector<128x128xf32>,
    } else {
    }
    %c0_i32_4 = arith.constant 0 : i32
    %6 = arith.cmpi sgt, %arg2, %c0_i32_4 : i32
    %7 = arith.extui %6 : i1 to i32
    %c0_i32_5 = arith.constant 0 : i32
    %8 = arith.cmpi ne, %7, %c0_i32_5 : i32
    scf.if %8 {
      %c0_6 = arith.constant 0 : index
      %c0_7 = arith.constant 0 : index
      %9 = vector.load %arg5[%c0_6, %c0_7] : memref<128x128xf32, #tpu.memory_space<vmem>>, vector<128x128xf32>
      %10 = arith.addf %9, %2 : vector<128x128xf32>
      %c0_8 = arith.constant 0 : index
      %c0_9 = arith.constant 0 : index
      %11 = vector.load %arg5[%c0_8, %c0_9] : memref<128x128xf32, #tpu.memory_space<vmem>>, vector<128x128xf32>
      tpu.vector_store %arg5[%c0_8, %c0_9], %10 {strides = array<i32>} : memref<128x128xf32, #tpu.memory_space<vmem>>, vector<128x128xf32>,
    } else {
    }
    return
  }
  func.func @transform_0(%arg0: i32, %arg1: i32, %arg2: i32) -> (i32, i32) {
    %c0_i32 = arith.constant 0 : i32
    return %arg0, %arg2 : i32, i32
  }
  func.func @transform_1(%arg0: i32, %arg1: i32, %arg2: i32) -> (i32, i32) {
    %c0_i32 = arith.constant 0 : i32
    return %arg2, %arg1 : i32, i32
  }
  func.func @transform_2(%arg0: i32, %arg1: i32, %arg2: i32) -> (i32, i32) {
    %c0_i32 = arith.constant 0 : i32
    return %arg0, %arg1 : i32, i32
  }
}

</mosaic_0001>

<bundles_post_ra>
// kernel: pallas_matmul.1
= control target key start
LH: loop header
LB: loop body
LE: loop exit
PB: predicated region body
PF: predicated region fallthrough
CT: control target
= control target key end

     0   :  { %7 = vsyncpa [#allocation3], 0  ;;  %s610_s0 = inlined_call_operand.hbm [shape: f32[128,256], index: 0, kind: input, shape index: {}]   ;;  %s611_s1 = inlined_call_operand.hbm [shape: f32[256,128], index: 1, kind: input, shape index: {}]   ;;  %s612_s2 = inlined_call_operand.hbm [shape: f32[128,128], index: 2, kind: output, shape index: {}]  }
   0x1   :  { %8 = vsyncpa [#allocation6], 0 }
   0x2   :  { %9 = vsyncpa [#allocation4], 0  ;;  %s546_s9 = smov [#allocation2]   ;;  %s474_s13 = scalar_lea.hbm %s610_s0, 4096 }
   0x3   :  { %s15_s10 = sshll.u32 %s546_s9, 4  ;;  %p475_p0 = scmp.ne.s32.totalorder %s610_s0, %s474_s13  ;;  %s16_s10 = int_to_ptr.vmem [resolvable:$true] %s15_s10 }
   0x4   :  { %p478_p1 = scmp.lt.u32.totalorder %s474_s13, %s610_s0 }
   0x6   :  { %p480_p2 = pnand %p478_p1, %p475_p0 }
   0x8   :  { %483 = shalt.err (!%p480_p2)
}
   0x9   :  { %s484_s18 = scalar_lea.vmem %s16_s10, 4096  ;;  %p489_p4 = scmp.lt.s32.totalorder %s16_s10, %s16_s10 }
   0xa   :  { %p485_p3 = scmp.ne.s32.totalorder %s16_s10, %s484_s18  ;;  %p490_p5 = scmp.lt.s32.totalorder %s484_s18, %s484_s18 }
   0xc   :  { %p491_p6 = por %p490_p5, %p489_p4 }
   0xe   :  { %p492_p7 = pnand %p491_p6, %p485_p3 }
  0x10   :  { %495 = shalt.err (!%p492_p7)
}
  0x11   :  { %s547_s19 = smov 256   ;;  %s548_s20 = smov 16  }
  0x12   :  { %21 = dma.hbm_to_vmem [thread:$0]  %s610_s0, 4096, %s16_s10, [#allocation3], %s547_s19, %s547_s19, %s548_s20  }
  0x13   :  { %s549_s23 = smov [#allocation5]   ;;  %s496_s27 = scalar_lea.hbm %s611_s1, 4096 }
  0x14   :  { %s27_s24 = sshll.u32 %s549_s23, 4  ;;  %p497_p8 = scmp.ne.s32.totalorder %s611_s1, %s496_s27  ;;  %s28_s24 = int_to_ptr.vmem [resolvable:$true] %s27_s24 }
  0x15   :  { %p500_p9 = scmp.lt.u32.totalorder %s496_s27, %s611_s1 }
  0x17   :  { %p502_p10 = pnand %p500_p9, %p497_p8 }
  0x19   :  { %505 = shalt.err (!%p502_p10)
}
  0x1a   :  { %s506_s4 = scalar_lea.vmem %s28_s24, 4096  ;;  %p511_p12 = scmp.lt.s32.totalorder %s28_s24, %s28_s24 }
  0x1b   :  { %p507_p11 = scmp.ne.s32.totalorder %s28_s24, %s506_s4  ;;  %p512_p13 = scmp.lt.s32.totalorder %s506_s4, %s506_s4 }
  0x1d   :  { %p513_p0 = por %p512_p13, %p511_p12 }
  0x1f   :  { %p514_p1 = pnand %p513_p0, %p507_p11 }
  0x21   :  { %517 = shalt.err (!%p514_p1)
}
  0x22   :  { %s550_s0 = smov 128   ;;  %s551_s5 = smov 8  }
  0x23   :  { %33 = dma.hbm_to_vmem [thread:$0]  %s611_s1, 4096, %s28_s24, [#allocation6], %s550_s0, %s550_s0, %s551_s5  }
  0x24   :  { %540 = dma.done.wait [#allocation3], 4096  }
  0x25   :  { %541 = vsyncadd [#allocation3], 4294963200 }
  0x26   :  { %542 = dma.done.wait [#allocation6], 4096  }
  0x27   :  { %543 = vsyncadd [#allocation6], 4294963200  ;;  %v88_v0 = vld [vmem:[#allocation5 + $0x80] sm:$0xff]  ;;  %v89_v1 = vld [vmem:[#allocation5 + $0x88] sm:$0xff]  ;;  %s552_s1 = smov [#allocation7]  }
  0x28   :  { %v72_v2 = vld [vmem:[#allocation5] sm:$0xff]  ;;  %v419_v3 = vpack.c.bf16 %v89_v1, %v88_v0  ;;  %v73_v4 = vld [vmem:[#allocation5 + $0x8] sm:$0xff]  ;;  %v90_v5 = vld [vmem:[#allocation5 + $0x90] sm:$0xff]  ;;  %s326_s8 = sshll.u32 %s552_s1, 4  ;;  %s327_s8 = int_to_ptr.vmem [resolvable:$true] %s326_s8 }
  0x29   :  { %v91_v6 = vld [vmem:[#allocation5 + $0x98] sm:$0xff]  ;;  %v421_v7 = vpack.c.bf16 %v73_v4, %v72_v2  ;;  %v74_v9 = vld [vmem:[#allocation5 + $0x10] sm:$0xff]  ;;  %v92_v11 = vld [vmem:[#allocation5 + $0xa0] sm:$0xff]  ;;  %s518_s9 = scalar_lea.vmem %s327_s8, 2048  ;;  %p523_p3 = scmp.lt.s32.totalorder %s327_s8, %s327_s8 }
  0x2a   :  { %v423_v8 = vpack.c.bf16 %v91_v6, %v90_v5  ;;  %v75_v10 = vld [vmem:[#allocation5 + $0x18] sm:$0xff]  ;;  %420 = vmatprep.subr.bf16.mxu0 %v419_v3  ;;  %451 = vmatprep.subr.bf16.mxu1 %v419_v3  ;;  %v93_v12 = vld [vmem:[#allocation5 + $0xa8] sm:$0xff]  ;;  %v76_v15 = vld [vmem:[#allocation5 + $0x20] sm:$0xff]  ;;  %p519_p2 = scmp.ne.s32.totalorder %s327_s8, %s518_s9  ;;  %p524_p4 = scmp.lt.s32.totalorder %s518_s9, %s518_s9 }
  0x2b   :  { %422 = vmatpush3.bf16.msra.mxu0 %v421_v7  ;;  %459 = vmatpush3.bf16.msra.mxu1 %v421_v7  ;;  %v425_v13 = vpack.c.bf16 %v75_v10, %v74_v9  ;;  %v427_v14 = vpack.c.bf16 %v93_v12, %v92_v11  ;;  %v77_v16 = vld [vmem:[#allocation5 + $0x28] sm:$0xff]  ;;  %v94_v17 = vld [vmem:[#allocation5 + $0xb0] sm:$0xff]  ;;  %v95_v18 = vld [vmem:[#allocation5 + $0xb8] sm:$0xff] }
  0x2c   :  { %424 = vmatprep.subr.bf16.mxu0 %v423_v8  ;;  %452 = vmatprep.subr.bf16.mxu1 %v423_v8  ;;  %v429_v19 = vpack.c.bf16 %v77_v16, %v76_v15  ;;  %v431_v20 = vpack.c.bf16 %v95_v18, %v94_v17  ;;  %v78_v21 = vld [vmem:[#allocation5 + $0x30] sm:$0xff]  ;;  %v79_v22 = vld [vmem:[#allocation5 + $0x38] sm:$0xff]  ;;  %v96_v23 = vld [vmem:[#allocation5 + $0xc0] sm:$0xff]  ;;  %p525_p5 = por %p524_p4, %p523_p3 }
  0x2d   :  { %v97_v24 = vld [vmem:[#allocation5 + $0xc8] sm:$0xff]  ;;  %v433_v27 = vpack.c.bf16 %v79_v22, %v78_v21  ;;  %v80_v29 = vld [vmem:[#allocation5 + $0x40] sm:$0xff]  ;;  %v98_v31 = vld [vmem:[#allocation5 + $0xd0] sm:$0xff] }
  0x2e   :  { %v41_v25 = vld [vmem:[#allocation2 + $0x8] sm:$0xff]  ;;  %v435_v28 = vpack.c.bf16 %v97_v24, %v96_v23  ;;  %v99_v32 = vld [vmem:[#allocation5 + $0xd8] sm:$0xff]  ;;  %v82_v35 = vld [vmem:[#allocation5 + $0x50] sm:$0xff]  ;;  %p526_p6 = pnand %p525_p5, %p519_p2 }
  0x2f   :  { %426 = vmatpush3.bf16.msra.mxu0 %v425_v13  ;;  %460 = vmatpush3.bf16.msra.mxu1 %v425_v13  ;;  %v57_v26 = vld [vmem:[#allocation2 + $0x88] sm:$0xff]  ;;  %v439_v34 = vpack.c.bf16 %v99_v32, %v98_v31  ;;  %v83_v36 = vld [vmem:[#allocation5 + $0x58] sm:$0xff]  ;;  %v100_v37 = vld [vmem:[#allocation5 + $0xe0] sm:$0xff] }
  0x30   :  { %428 = vmatprep.subr.bf16.mxu0 %v427_v14  ;;  %453 = vmatprep.subr.bf16.mxu1 %v427_v14  ;;  %v81_v30 = vld [vmem:[#allocation5 + $0x48] sm:$0xff]  ;;  %v441_v39 = vpack.c.bf16 %v83_v36, %v82_v35  ;;  %v84_v41 = vld [vmem:[#allocation5 + $0x60] sm:$0xff]  ;;  %v102_v43 = vld [vmem:[#allocation5 + $0xf0] sm:$0xff] }
  0x31   :  { %168 = vmatprep.mubr.f32.mxu0 %v41_v25  ;;  %208 = vmatprep.mubr.f32.mxu1 %v57_v26  ;;  %v437_v33 = vpack.c.bf16 %v81_v30, %v80_v29  ;;  %v101_v38 = vld [vmem:[#allocation5 + $0xe8] sm:$0xff]  ;;  %v103_v44 = vld [vmem:[#allocation5 + $0xf8] sm:$0xff]  ;;  %v86_v47 = vld [vmem:[#allocation5 + $0x70] sm:$0xff] }
  0x32   :  { %v443_v40 = vpack.c.bf16 %v101_v38, %v100_v37  ;;  %v85_v42 = vld [vmem:[#allocation5 + $0x68] sm:$0xff]  ;;  %v447_v46 = vpack.c.bf16 %v103_v44, %v102_v43  ;;  %v87_v48 = vld [vmem:[#allocation5 + $0x78] sm:$0xff]  ;;  %v40_v50 = vld [vmem:[#allocation2] sm:$0xff] }
  0x33   :  { %430 = vmatpush3.bf16.msra.mxu0 %v429_v19  ;;  %461 = vmatpush3.bf16.msra.mxu1 %v429_v19  ;;  %v445_v45 = vpack.c.bf16 %v85_v42, %v84_v41  ;;  %v449_v49 = vpack.c.bf16 %v87_v48, %v86_v47  ;;  %v56_v51 = vld [vmem:[#allocation2 + $0x80] sm:$0xff]  ;;  %v43_v52 = vld [vmem:[#allocation2 + $0x18] sm:$0xff]  ;;  %v42_v54 = vld [vmem:[#allocation2 + $0x10] sm:$0xff] }
  0x34   :  { %432 = vmatprep.subr.bf16.mxu0 %v431_v20  ;;  %454 = vmatprep.subr.bf16.mxu1 %v431_v20  ;;  %v59_v53 = vld [vmem:[#allocation2 + $0x98] sm:$0xff]  ;;  %v58_v55 = vld [vmem:[#allocation2 + $0x90] sm:$0xff]  ;;  %v45_v56 = vld [vmem:[#allocation2 + $0x28] sm:$0xff] }
  0x35   :  { %v61_v57 = vld [vmem:[#allocation2 + $0xa8] sm:$0xff]  ;;  %v44_v58 = vld [vmem:[#allocation2 + $0x20] sm:$0xff]  ;;  %v47_v60 = vld [vmem:[#allocation2 + $0x38] sm:$0xff] }
  0x36   :  { %v60_v59 = vld [vmem:[#allocation2 + $0xa0] sm:$0xff]  ;;  %v63_v61 = vld [vmem:[#allocation2 + $0xb8] sm:$0xff]  ;;  %v46_v62 = vld [vmem:[#allocation2 + $0x30] sm:$0xff] }
  0x37   :  { %434 = vmatpush3.bf16.msra.mxu0 %v433_v27  ;;  %462 = vmatpush3.bf16.msra.mxu1 %v433_v27  ;;  %v62_v63 = vld [vmem:[#allocation2 + $0xb0] sm:$0xff]  ;;  %v49_v0 = vld [vmem:[#allocation2 + $0x48] sm:$0xff]  ;;  %v48_v2 = vld [vmem:[#allocation2 + $0x40] sm:$0xff] }
  0x38   :  { %436 = vmatprep.subr.bf16.mxu0 %v435_v28  ;;  %455 = vmatprep.subr.bf16.mxu1 %v435_v28  ;;  %v65_v1 = vld [vmem:[#allocation2 + $0xc8] sm:$0xff]  ;;  %v64_v3 = vld [vmem:[#allocation2 + $0xc0] sm:$0xff]  ;;  %v51_v4 = vld [vmem:[#allocation2 + $0x58] sm:$0xff] }
  0x39   :  { %v67_v5 = vld [vmem:[#allocation2 + $0xd8] sm:$0xff]  ;;  %v50_v6 = vld [vmem:[#allocation2 + $0x50] sm:$0xff]  ;;  %v53_v8 = vld [vmem:[#allocation2 + $0x68] sm:$0xff] }
  0x3a   :  { %v66_v7 = vld [vmem:[#allocation2 + $0xd0] sm:$0xff]  ;;  %v69_v9 = vld [vmem:[#allocation2 + $0xe8] sm:$0xff]  ;;  %v52_v10 = vld [vmem:[#allocation2 + $0x60] sm:$0xff] }
  0x3b   :  { %438 = vmatpush3.bf16.msra.mxu0 %v437_v33  ;;  %463 = vmatpush3.bf16.msra.mxu1 %v437_v33  ;;  %v68_v11 = vld [vmem:[#allocation2 + $0xe0] sm:$0xff]  ;;  %v55_v12 = vld [vmem:[#allocation2 + $0x78] sm:$0xff]  ;;  %v54_v14 = vld [vmem:[#allocation2 + $0x70] sm:$0xff] }
  0x3c   :  { %440 = vmatprep.subr.bf16.mxu0 %v439_v34  ;;  %456 = vmatprep.subr.bf16.mxu1 %v439_v34  ;;  %v71_v13 = vld [vmem:[#allocation2 + $0xf8] sm:$0xff]  ;;  %v70_v15 = vld [vmem:[#allocation2 + $0xf0] sm:$0xff] }
  0x3f   :  { %442 = vmatpush3.bf16.msra.mxu0 %v441_v39  ;;  %464 = vmatpush3.bf16.msra.mxu1 %v441_v39 }
  0x40   :  { %444 = vmatprep.subr.bf16.mxu0 %v443_v40  ;;  %457 = vmatprep.subr.bf16.mxu1 %v443_v40 }
  0x43   :  { %446 = vmatpush3.bf16.msra.mxu0 %v445_v45  ;;  %465 = vmatpush3.bf16.msra.mxu1 %v445_v45 }
  0x44   :  { %448 = vmatprep.subr.bf16.mxu0 %v447_v46  ;;  %458 = vmatprep.subr.bf16.mxu1 %v447_v46 }
  0x47   :  { %450 = vmatpush3.bf16.msra.mxu0 %v449_v49  ;;  %466 = vmatpush3.bf16.msra.mxu1 %v449_v49 }
  0x4a   :  { %169 = vmatmul.mubr.f32.vlgmr.msra.gmra.mrb[0].mxu0 %v40_v50  ;;  %209 = vmatmul.mubr.f32.vlgmr.msra.gmra.mrb[0].mxu1 %v56_v51 }
  0x4b   :  { %173 = vmatprep.mubr.f32.mxu0 %v43_v52  ;;  %213 = vmatprep.mubr.f32.mxu1 %v59_v53 }
  0x4e   :  { %174 = vmatmul.mubr.f32.gmra.mrb[2].mxu0 %v42_v54  ;;  %214 = vmatmul.mubr.f32.gmra.mrb[2].mxu1 %v58_v55 }
  0x4f   :  { %178 = vmatprep.mubr.f32.mxu0 %v45_v56  ;;  %218 = vmatprep.mubr.f32.mxu1 %v61_v57 }
  0x52   :  { %179 = vmatmul.mubr.f32.gmra.mrb[4].mxu0 %v44_v58  ;;  %219 = vmatmul.mubr.f32.gmra.mrb[4].mxu1 %v60_v59 }
  0x53   :  { %183 = vmatprep.mubr.f32.mxu0 %v47_v60  ;;  %223 = vmatprep.mubr.f32.mxu1 %v63_v61 }
  0x56   :  { %184 = vmatmul.mubr.f32.gmra.mrb[6].mxu0 %v46_v62  ;;  %224 = vmatmul.mubr.f32.gmra.mrb[6].mxu1 %v62_v63 }
  0x57   :  { %188 = vmatprep.mubr.f32.mxu0 %v49_v0  ;;  %228 = vmatprep.mubr.f32.mxu1 %v65_v1 }
  0x5a   :  { %189 = vmatmul.mubr.f32.gmra.mrb[8].mxu0 %v48_v2  ;;  %229 = vmatmul.mubr.f32.gmra.mrb[8].mxu1 %v64_v3 }
  0x5b   :  { %193 = vmatprep.mubr.f32.mxu0 %v51_v4  ;;  %233 = vmatprep.mubr.f32.mxu1 %v67_v5 }
  0x5e   :  { %194 = vmatmul.mubr.f32.gmra.mrb[10].mxu0 %v50_v6  ;;  %234 = vmatmul.mubr.f32.gmra.mrb[10].mxu1 %v66_v7 }
  0x5f   :  { %198 = vmatprep.mubr.f32.mxu0 %v53_v8  ;;  %238 = vmatprep.mubr.f32.mxu1 %v69_v9 }
  0x62   :  { %199 = vmatmul.mubr.f32.gmra.mrb[12].mxu0 %v52_v10  ;;  %239 = vmatmul.mubr.f32.gmra.mrb[12].mxu1 %v68_v11 }
  0x63   :  { %203 = vmatprep.mubr.f32.mxu0 %v55_v12  ;;  %243 = vmatprep.mubr.f32.mxu1 %v71_v13 }
  0x66   :  { %204 = vmatmul.mubr.f32.gmra.mrb[14].mxu0 %v54_v14  ;;  %244 = vmatmul.mubr.f32.gmra.mrb[14].mxu1 %v70_v15 }
 0x11d   :  { %v371_v16 = vpop.f32.mrb[0].mxu0  ;;  %v395_v17 = vpop.f32.mrb[0].mxu1 }
 0x11e   :  { %v372_v18 = vpop.f32.mrb[1].mxu0  ;;  %v396_v19 = vpop.f32.mrb[1].mxu1 }
 0x11f   :  { %v373_v20 = vadd.f32 %v372_v18, %v371_v16  ;;  %v397_v21 = vadd.f32 %v396_v19, %v395_v17 }
 0x121   :  { %253 = vst [vmem:[#allocation7] sm:$0xff] %v373_v20  ;;  %261 = vst [vmem:[#allocation7 + $0x40] sm:$0xff] %v397_v21  ;;  %v374_v22 = vpop.f32.mrb[2].mxu0  ;;  %v398_v23 = vpop.f32.mrb[2].mxu1 }
 0x122   :  { %v375_v24 = vpop.f32.mrb[3].mxu0  ;;  %v399_v25 = vpop.f32.mrb[3].mxu1 }
 0x123   :  { %v376_v26 = vadd.f32 %v375_v24, %v374_v22  ;;  %v400_v27 = vadd.f32 %v399_v25, %v398_v23 }
 0x125   :  { %254 = vst [vmem:[#allocation7 + $0x8] sm:$0xff] %v376_v26  ;;  %262 = vst [vmem:[#allocation7 + $0x48] sm:$0xff] %v400_v27  ;;  %v377_v28 = vpop.f32.mrb[4].mxu0  ;;  %v401_v29 = vpop.f32.mrb[4].mxu1 }
 0x126   :  { %v378_v30 = vpop.f32.mrb[5].mxu0  ;;  %v402_v31 = vpop.f32.mrb[5].mxu1 }
 0x127   :  { %v379_v32 = vadd.f32 %v378_v30, %v377_v28  ;;  %v403_v33 = vadd.f32 %v402_v31, %v401_v29 }
 0x129   :  { %255 = vst [vmem:[#allocation7 + $0x10] sm:$0xff] %v379_v32  ;;  %263 = vst [vmem:[#allocation7 + $0x50] sm:$0xff] %v403_v33  ;;  %v380_v34 = vpop.f32.mrb[6].mxu0  ;;  %v404_v35 = vpop.f32.mrb[6].mxu1 }
 0x12a   :  { %v381_v36 = vpop.f32.mrb[7].mxu0  ;;  %v405_v37 = vpop.f32.mrb[7].mxu1 }
 0x12b   :  { %v382_v38 = vadd.f32 %v381_v36, %v380_v34  ;;  %v406_v39 = vadd.f32 %v405_v37, %v404_v35 }
 0x12d   :  { %256 = vst [vmem:[#allocation7 + $0x18] sm:$0xff] %v382_v38  ;;  %264 = vst [vmem:[#allocation7 + $0x58] sm:$0xff] %v406_v39  ;;  %v383_v40 = vpop.f32.mrb[8].mxu0  ;;  %v407_v41 = vpop.f32.mrb[8].mxu1 }
 0x12e   :  { %v384_v42 = vpop.f32.mrb[9].mxu0  ;;  %v408_v43 = vpop.f32.mrb[9].mxu1 }
 0x12f   :  { %v385_v44 = vadd.f32 %v384_v42, %v383_v40  ;;  %v409_v45 = vadd.f32 %v408_v43, %v407_v41 }
 0x131   :  { %257 = vst [vmem:[#allocation7 + $0x20] sm:$0xff] %v385_v44  ;;  %265 = vst [vmem:[#allocation7 + $0x60] sm:$0xff] %v409_v45  ;;  %v386_v46 = vpop.f32.mrb[10].mxu0  ;;  %v410_v47 = vpop.f32.mrb[10].mxu1 }
 0x132   :  { %v387_v48 = vpop.f32.mrb[11].mxu0  ;;  %v411_v49 = vpop.f32.mrb[11].mxu1 }
 0x133   :  { %v388_v50 = vadd.f32 %v387_v48, %v386_v46  ;;  %v412_v51 = vadd.f32 %v411_v49, %v410_v47 }
 0x135   :  { %258 = vst [vmem:[#allocation7 + $0x28] sm:$0xff] %v388_v50  ;;  %266 = vst [vmem:[#allocation7 + $0x68] sm:$0xff] %v412_v51  ;;  %v389_v52 = vpop.f32.mrb[12].mxu0  ;;  %v413_v53 = vpop.f32.mrb[12].mxu1 }
 0x136   :  { %v390_v54 = vpop.f32.mrb[13].mxu0  ;;  %v414_v55 = vpop.f32.mrb[13].mxu1 }
 0x137   :  { %v391_v56 = vadd.f32 %v390_v54, %v389_v52  ;;  %v415_v57 = vadd.f32 %v414_v55, %v413_v53 }
 0x139   :  { %259 = vst [vmem:[#allocation7 + $0x30] sm:$0xff] %v391_v56  ;;  %267 = vst [vmem:[#allocation7 + $0x70] sm:$0xff] %v415_v57  ;;  %v392_v58 = vpop.f32.mrb[14].mxu0  ;;  %v416_v59 = vpop.f32.mrb[14].mxu1 }
 0x13a   :  { %v393_v60 = vpop.f32.mrb[15].mxu0  ;;  %v417_v61 = vpop.f32.mrb[15].mxu1 }
 0x13b   :  { %v394_v62 = vadd.f32 %v393_v60, %v392_v58  ;;  %v418_v63 = vadd.f32 %v417_v61, %v416_v59 }
 0x13d   :  { %260 = vst [vmem:[#allocation7 + $0x38] sm:$0xff] %v394_v62  ;;  %268 = vst [vmem:[#allocation7 + $0x78] sm:$0xff] %v418_v63 }
 0x13e   :  { %529 = shalt.err (!%p526_p6)
}
 0x13f   :  { %s530_s12 = scalar_lea.hbm %s612_s2, 2048 }
 0x140   :  { %p531_p7 = scmp.ne.s32.totalorder %s612_s2, %s530_s12  ;;  %p534_p8 = scmp.lt.u32.totalorder %s530_s12, %s612_s2 }
 0x142   :  { %p536_p9 = pnand %p534_p8, %p531_p7 }
 0x144   :  { %539 = shalt.err (!%p536_p9)
}
 0x145   :  { %332 = dma.vmem_to_hbm [thread:$0]  %s327_s8, 2048, %s612_s2, [#allocation4], %s550_s0, %s550_s0, %s551_s5  }
 0x146   :  { %544 = dma.done.wait [#allocation4], 2048  }
 0x147   :  { %545 = vsyncadd [#allocation4], 4294965248 }
 0x148   :  { %336 = vsyncpa [#allocation3], 1 }
 0x149   :  { %337 = vsyncpa [#allocation6], 1 }
 0x14a   :  { %338 = vsyncpa [#allocation4], 1 }

</bundles_post_ra>
